<compile_context>
chip_gen: v6e
topology: v6e:2x2x1
jax: 0.10.0
libtpu: 0.0.40
codegen_flags: <defaults>
</compile_context>

<pallas_src>
import math
from functools import partial

import jax
import jax.numpy as jnp
from jax.experimental import pallas as pl
from jax.experimental.pallas import tpu as pltpu


def _self_attn_kernel(x_ref, gamma_ref, beta_ref,
                      wq_ref, bq_ref, wk_ref, bk_ref, wv_ref, bv_ref,
                      wproj_ref, bproj_ref, o_ref, attn_ref, *,
                      b_tile, seq, nheads, dhead, eps, mxu_dtype,
                      channels_first, approx_recip):
    C = nheads * dhead
    rows = b_tile * seq

    # ---- fused layout change: (b, C, S) -> (b, S, C) on the XLU (no HBM trip)
    x = x_ref[...].astype(jnp.float32)
    if channels_first:
        x = jnp.swapaxes(x, 1, 2)                  # (b_tile, seq, C)
    x = x.reshape(rows, C)

    # ---- LayerNorm (f32 stats, biased variance, eps like PyTorch) ----------
    mean = jnp.mean(x, axis=-1, keepdims=True)
    xc = x - mean
    var = jnp.mean(xc * xc, axis=-1, keepdims=True)
    y = xc * jax.lax.rsqrt(var + eps)
    y = (y * gamma_ref[...] + beta_ref[...]).astype(mxu_dtype)   # bf16 only as MXU input

    # ---- Q/K/V projections: three dots, no (rows, 3C) f32 intermediate -----
    # W_q already carries 1/scale (weights AND bias), heads grouped contiguously.
    q = (jnp.dot(y, wq_ref[...], preferred_element_type=jnp.float32)
         + bq_ref[...]).astype(mxu_dtype)
    k = (jnp.dot(y, wk_ref[...], preferred_element_type=jnp.float32)
         + bk_ref[...]).astype(mxu_dtype)
    v = (jnp.dot(y, wv_ref[...], preferred_element_type=jnp.float32)
         + bv_ref[...]).astype(mxu_dtype)

    # ---- attention: batched over samples, Python unroll only over heads.
    #      Each head's output goes straight into the VMEM scratch at a static
    #      column offset -> no list + lane concat, live ranges stay bounded
    #      and the unrolled block count does not grow with b_tile.
    d = dhead
    for h in range(nheads):
        c0 = h * d
        qh = q[:, c0:c0 + d].reshape(b_tile, seq, d)
        kh = k[:, c0:c0 + d].reshape(b_tile, seq, d)
        vh = v[:, c0:c0 + d].reshape(b_tile, seq, d)
        s = jnp.einsum('bqd,bkd->bqk', qh, kh,
                       preferred_element_type=jnp.float32)       # (b, S, S) f32
        s = s - jnp.max(s, axis=-1, keepdims=True)
        p = jnp.exp(s)
        l = jnp.sum(p, axis=-1, keepdims=True)
        o = jnp.einsum('bqk,bkd->bqd', p.astype(mxu_dtype), vh,
                       preferred_element_type=jnp.float32)
        # Normalize after the (S, d) matmul; reciprocal runs on the EUP slot.
        inv_l = pl.reciprocal(l, approx=True) if approx_recip else 1.0 / l
        attn_ref[:, c0:c0 + d] = (o * inv_l).reshape(rows, d)

    # ---- output projection + fused (b, S, C) -> (b, C, S) writeback --------
    out = jnp.dot(attn_ref[...].astype(mxu_dtype), wproj_ref[...],
                  preferred_element_type=jnp.float32) + bproj_ref[...]
    out = out.reshape(b_tile, seq, C)
    if channels_first:
        out = jnp.swapaxes(out, 1, 2)              # (b_tile, C, seq)
    o_ref[...] = out.astype(o_ref.dtype)


def self_attention(x, params, *, nheads, transpose=True, b_tile=None,
                   mxu_dtype=jnp.bfloat16, eps=1e-5, approx_recip=True):
    """x: (N, C, S) if transpose else (N, S, C).  Returns same layout/dtype."""
    gamma, beta, wqkv, bqkv, wproj, bproj = params

    if transpose:
        n, C, s_len = x.shape
    else:
        n, s_len, C = x.shape
    dhead = C // nheads
    scale = math.sqrt(C / nheads)

    # ---- host-side weight prep (layout only, one-time) ---------------------
    # De-interleave fused-QKV columns: (in, h, {q,k,v}, d) -> ({q,k,v}, in, h, d),
    # split into W_q/W_k/W_v, fold 1/scale into the Q columns, cast MXU
    # operands to bf16.  Biases / LN params stay f32 (added to f32 accums).
    w3 = jnp.transpose(wqkv.reshape(C, nheads, 3, dhead), (2, 0, 1, 3)).reshape(3, C, C)
    b3 = jnp.transpose(jnp.reshape(bqkv, (nheads, 3, dhead)), (1, 0, 2)).reshape(3, C)
    wq = (w3[0].astype(jnp.float32) / scale).astype(mxu_dtype)
    wk = w3[1].astype(mxu_dtype)
    wv = w3[2].astype(mxu_dtype)
    bq = (b3[0].astype(jnp.float32) / scale).reshape(1, C)
    bk = b3[1].astype(jnp.float32).reshape(1, C)
    bv = b3[2].astype(jnp.float32).reshape(1, C)
    wproj_c = wproj.astype(mxu_dtype)
    bproj_c = jnp.reshape(bproj, (1, C)).astype(jnp.float32)
    gamma_c = jnp.reshape(gamma, (1, C)).astype(jnp.float32)
    beta_c = jnp.reshape(beta, (1, C)).astype(jnp.float32)

    # ---- batch tiling: biggest row slab that keeps >= 2 grid steps ---------
    # (>= 2 steps lets "parallel" shard across v7x's two TensorCores and keeps
    # the in/out DMA pipeline alive).  Block minor dims equal full array dims,
    # so any divisor of N is layout-legal — no %8 fallback needed.
    max_rows = 1024          # per-step row slab cap (VMEM vs per-step overhead)
    if b_tile is None:
        divisors = [d for d in range(1, n + 1) if n % d == 0]
        cands = [d for d in divisors if d * s_len <= max_rows] or [1]
        multi = [d for d in cands if n // d >= 2]
        b_tile = max(multi) if multi else max(cands)
    assert n % b_tile == 0, "b_tile must divide the batch"
    rows = b_tile * s_len

    # Blocks are read/written directly in the input layout (transpose fused).
    if transpose:
        block = (b_tile, C, s_len)
    else:
        block = (b_tile, s_len, C)
    data_map = lambda i: (i, 0, 0)

    def _const_spec(shape):
        imap = lambda i: (0,) * len(shape)
        try:   # single-buffer constant-index operands (saves 2x weight VMEM)
            return pl.BlockSpec(shape, imap, pipeline_mode=pl.Buffered(1))
        except TypeError:
            return pl.BlockSpec(shape, imap)

    kernel = partial(_self_attn_kernel, b_tile=b_tile, seq=s_len,
                     nheads=nheads, dhead=dhead, eps=eps, mxu_dtype=mxu_dtype,
                     channels_first=transpose, approx_recip=approx_recip)

    out = pl.pallas_call(
        kernel,
        out_shape=jax.ShapeDtypeStruct(x.shape, x.dtype),
        grid_spec=pltpu.PrefetchScalarGridSpec(
            num_scalar_prefetch=0,
            grid=(n // b_tile,),
            in_specs=[
                pl.BlockSpec(block, data_map),     # x (layout preserved)
                _const_spec((1, C)),               # gamma
                _const_spec((1, C)),               # beta
                _const_spec((C, C)),               # W_q (scale folded)
                _const_spec((1, C)),               # b_q (scale folded)
                _const_spec((C, C)),               # W_k
                _const_spec((1, C)),               # b_k
                _const_spec((C, C)),               # W_v
                _const_spec((1, C)),               # b_v
                _const_spec((C, C)),               # W_proj
                _const_spec((1, C)),               # b_proj
            ],
            out_specs=pl.BlockSpec(block, data_map),
            scratch_shapes=[pltpu.VMEM((rows, C), jnp.float32)],   # attn slab
        ),
        compiler_params=pltpu.CompilerParams(
            dimension_semantics=("parallel",),
            vmem_limit_bytes=48 * 1024 * 1024),    # v7x-safe (64 MiB/TC)
    )(x, gamma_c, beta_c, wq, bq, wk, bk, wv, bv, wproj_c, bproj_c)
    return out


def _reference(x, params, *, nheads, transpose=True):
    """Pure-JAX (f32) replica of the PyTorch forward, for verification."""
    gamma, beta, wqkv, bqkv, wproj, bproj = params
    xt = jnp.transpose(x, (0, 2, 1)) if transpose else x
    n, s_len, ni = xt.shape
    d = ni // nheads
    mean = xt.mean(-1, keepdims=True)
    var = ((xt - mean) ** 2).mean(-1, keepdims=True)
    y = (xt - mean) / jnp.sqrt(var + 1e-5) * gamma + beta
    qkv = y @ wqkv + bqkv                                    # (n, s, 3*ni)
    qkv = qkv.reshape(n, s_len, nheads, 3 * d)
    qkv = qkv.transpose(0, 2, 1, 3).reshape(n * nheads, s_len, 3 * d)
    q, k, v = jnp.split(qkv, 3, axis=-1)
    sc = jnp.einsum('bqd,bkd->bqk', q, k) / math.sqrt(ni / nheads)
    p = jax.nn.softmax(sc, axis=-1)
    o = jnp.einsum('bqk,bkd->bqd', p, v)
    o = o.reshape(n, nheads, s_len, d).transpose(0, 2, 1, 3).reshape(n, s_len, ni)
    o = o @ wproj + bproj
    return jnp.transpose(o, (0, 2, 1)) if transpose else o


if __name__ == "__main__":
    # Module hyperparams (forward implies x: (N, ni, S) with transpose=True)
    ni, attn_chans = 32, 8
    nheads = ni // attn_chans
    n, s_len = 2, 16

    key = jax.random.PRNGKey(0)
    k1, k2, k3, k4, kx = jax.random.split(key, 5)

    # Deterministic parameter init (PyTorch-Linear-style uniform bounds).
    bound = 1.0 / math.sqrt(ni)
    wqkv = jax.random.uniform(k1, (ni, 3 * ni), jnp.float32, -bound, bound)  # (in, out)
    bqkv = jax.random.uniform(k2, (3 * ni,), jnp.float32, -bound, bound)
    wproj = jax.random.uniform(k3, (ni, ni), jnp.float32, -bound, bound)     # (in, out)
    bproj = jax.random.uniform(k4, (ni,), jnp.float32, -bound, bound)
    gamma = jnp.ones((ni,), jnp.float32)    # LayerNorm weight
    beta = jnp.zeros((ni,), jnp.float32)    # LayerNorm bias
    params = (gamma, beta, wqkv, bqkv, wproj, bproj)

    x = jax.random.normal(kx, (n, ni, s_len), jnp.float32)   # (N, C=ni, S)

    out = self_attention(x, params, nheads=nheads, transpose=True)
    out = jax.block_until_ready(out)

    ref = _reference(x, params, nheads=nheads, transpose=True)
    assert out.shape == (n, ni, s_len)
    # bf16 MXU operands + approx reciprocal -> bf16-level tolerance.
    assert jnp.allclose(out, ref, atol=3e-2, rtol=3e-2), "mismatch vs reference"

    print("KERNEL_OK")
</pallas_src>

<mosaic_0001>
module attributes {stable_mosaic.version = 11 : i64} {
  func.func @_self_attn_kernel(%arg0: i32, %arg1: memref<1x32x16xf32, #tpu.memory_space<vmem>>, %arg2: memref<1x32xf32, #tpu.memory_space<vmem>>, %arg3: memref<1x32xf32, #tpu.memory_space<vmem>>, %arg4: memref<32x32xbf16, #tpu.memory_space<vmem>>, %arg5: memref<1x32xf32, #tpu.memory_space<vmem>>, %arg6: memref<32x32xbf16, #tpu.memory_space<vmem>>, %arg7: memref<1x32xf32, #tpu.memory_space<vmem>>, %arg8: memref<32x32xbf16, #tpu.memory_space<vmem>>, %arg9: memref<1x32xf32, #tpu.memory_space<vmem>>, %arg10: memref<32x32xbf16, #tpu.memory_space<vmem>>, %arg11: memref<1x32xf32, #tpu.memory_space<vmem>>, %arg12: memref<1x32x16xf32, #tpu.memory_space<vmem>>, %arg13: memref<16x32xf32, #tpu.memory_space<vmem>>) attributes {dimension_semantics = [#tpu.dimension_semantics<parallel>], iteration_bounds = array<i64: 2>, scalar_prefetch = 0 : i64, scratch_operands = 1 : i64, tpu.core_type = #tpu.core_type<tc>, window_params = [{transform_indices = @transform_0, window_bounds = array<i64: 1, 32, 16>}, {pipeline_mode = #tpu.pipeline_mode<synchronous>, transform_indices = @transform_1, window_bounds = array<i64: 1, 32>}, {pipeline_mode = #tpu.pipeline_mode<synchronous>, transform_indices = @transform_2, window_bounds = array<i64: 1, 32>}, {pipeline_mode = #tpu.pipeline_mode<synchronous>, transform_indices = @transform_3, window_bounds = array<i64: 32, 32>}, {pipeline_mode = #tpu.pipeline_mode<synchronous>, transform_indices = @transform_4, window_bounds = array<i64: 1, 32>}, {pipeline_mode = #tpu.pipeline_mode<synchronous>, transform_indices = @transform_5, window_bounds = array<i64: 32, 32>}, {pipeline_mode = #tpu.pipeline_mode<synchronous>, transform_indices = @transform_6, window_bounds = array<i64: 1, 32>}, {pipeline_mode = #tpu.pipeline_mode<synchronous>, transform_indices = @transform_7, window_bounds = array<i64: 32, 32>}, {pipeline_mode = #tpu.pipeline_mode<synchronous>, transform_indices = @transform_8, window_bounds = array<i64: 1, 32>}, {pipeline_mode = #tpu.pipeline_mode<synchronous>, transform_indices = @transform_9, window_bounds = array<i64: 32, 32>}, {pipeline_mode = #tpu.pipeline_mode<synchronous>, transform_indices = @transform_10, window_bounds = array<i64: 1, 32>}, {transform_indices = @transform_11, window_bounds = array<i64: 1, 32, 16>}]} {
    %c0 = arith.constant 0 : index
    %c0_0 = arith.constant 0 : index
    %c0_1 = arith.constant 0 : index
    %0 = vector.load %arg1[%c0, %c0_0, %c0_1] : memref<1x32x16xf32, #tpu.memory_space<vmem>>, vector<1x32x16xf32>
    %1 = tpu.transpose %0, [0, 2, 1] : vector<1x32x16xf32> -> vector<1x16x32xf32>
    %2 = vector.shape_cast %1 : vector<1x16x32xf32> to vector<16x32xf32>
    %cst = arith.constant dense<0.000000e+00> : vector<16xf32>
    %3 = vector.multi_reduction <add>, %2, %cst [1] : vector<16x32xf32> to vector<16xf32>
    %4 = vector.shape_cast %3 : vector<16xf32> to vector<16x1xf32>
    %cst_2 = arith.constant 3.200000e+01 : f32
    %5 = vector.broadcast %cst_2 : f32 to vector<16x1xf32>
    %6 = arith.divf %4, %5 : vector<16x1xf32>
    %7 = vector.broadcast %6 : vector<16x1xf32> to vector<16x32xf32>
    %8 = arith.subf %2, %7 : vector<16x32xf32>
    %9 = arith.mulf %8, %8 : vector<16x32xf32>
    %cst_3 = arith.constant dense<0.000000e+00> : vector<16xf32>
    %10 = vector.multi_reduction <add>, %9, %cst_3 [1] : vector<16x32xf32> to vector<16xf32>
    %11 = vector.shape_cast %10 : vector<16xf32> to vector<16x1xf32>
    %cst_4 = arith.constant 3.200000e+01 : f32
    %12 = vector.broadcast %cst_4 : f32 to vector<16x1xf32>
    %13 = arith.divf %11, %12 : vector<16x1xf32>
    %cst_5 = arith.constant 9.99999974E-6 : f32
    %14 = vector.broadcast %cst_5 : f32 to vector<16x1xf32>
    %15 = arith.addf %13, %14 : vector<16x1xf32>
    %16 = math.rsqrt %15 : vector<16x1xf32>
    %17 = vector.broadcast %16 : vector<16x1xf32> to vector<16x32xf32>
    %18 = arith.mulf %8, %17 : vector<16x32xf32>
    %c0_6 = arith.constant 0 : index
    %c0_7 = arith.constant 0 : index
    %19 = vector.load %arg2[%c0_6, %c0_7] : memref<1x32xf32, #tpu.memory_space<vmem>>, vector<1x32xf32>
    %20 = vector.broadcast %19 : vector<1x32xf32> to vector<16x32xf32>
    %21 = arith.mulf %18, %20 : vector<16x32xf32>
    %c0_8 = arith.constant 0 : index
    %c0_9 = arith.constant 0 : index
    %22 = vector.load %arg3[%c0_8, %c0_9] : memref<1x32xf32, #tpu.memory_space<vmem>>, vector<1x32xf32>
    %23 = vector.broadcast %22 : vector<1x32xf32> to vector<16x32xf32>
    %24 = arith.addf %21, %23 : vector<16x32xf32>
    %25 = arith.truncf %24 : vector<16x32xf32> to vector<16x32xbf16>
    %c0_10 = arith.constant 0 : index
    %c0_11 = arith.constant 0 : index
    %26 = vector.load %arg4[%c0_10, %c0_11] : memref<32x32xbf16, #tpu.memory_space<vmem>>, vector<32x32xbf16>
    %cst_12 = arith.constant dense<0.000000e+00> : vector<16x32xf32>
    %27 = tpu.matmul %25, %26, %cst_12 {dimension_numbers = #tpu.dot_dimension_numbers<[1], [0], [0], [1], [0, 0, 1, 1], [], []>} : vector<16x32xbf16>, vector<32x32xbf16>, vector<16x32xf32> -> vector<16x32xf32>
    %c0_13 = arith.constant 0 : index
    %c0_14 = arith.constant 0 : index
    %28 = vector.load %arg5[%c0_13, %c0_14] : memref<1x32xf32, #tpu.memory_space<vmem>>, vector<1x32xf32>
    %29 = vector.broadcast %28 : vector<1x32xf32> to vector<16x32xf32>
    %30 = arith.addf %27, %29 : vector<16x32xf32>
    %31 = arith.truncf %30 : vector<16x32xf32> to vector<16x32xbf16>
    %c0_15 = arith.constant 0 : index
    %c0_16 = arith.constant 0 : index
    %32 = vector.load %arg6[%c0_15, %c0_16] : memref<32x32xbf16, #tpu.memory_space<vmem>>, vector<32x32xbf16>
    %cst_17 = arith.constant dense<0.000000e+00> : vector<16x32xf32>
    %33 = tpu.matmul %25, %32, %cst_17 {dimension_numbers = #tpu.dot_dimension_numbers<[1], [0], [0], [1], [0, 0, 1, 1], [], []>} : vector<16x32xbf16>, vector<32x32xbf16>, vector<16x32xf32> -> vector<16x32xf32>
    %c0_18 = arith.constant 0 : index
    %c0_19 = arith.constant 0 : index
    %34 = vector.load %arg7[%c0_18, %c0_19] : memref<1x32xf32, #tpu.memory_space<vmem>>, vector<1x32xf32>
    %35 = vector.broadcast %34 : vector<1x32xf32> to vector<16x32xf32>
    %36 = arith.addf %33, %35 : vector<16x32xf32>
    %37 = arith.truncf %36 : vector<16x32xf32> to vector<16x32xbf16>
    %c0_20 = arith.constant 0 : index
    %c0_21 = arith.constant 0 : index
    %38 = vector.load %arg8[%c0_20, %c0_21] : memref<32x32xbf16, #tpu.memory_space<vmem>>, vector<32x32xbf16>
    %cst_22 = arith.constant dense<0.000000e+00> : vector<16x32xf32>
    %39 = tpu.matmul %25, %38, %cst_22 {dimension_numbers = #tpu.dot_dimension_numbers<[1], [0], [0], [1], [0, 0, 1, 1], [], []>} : vector<16x32xbf16>, vector<32x32xbf16>, vector<16x32xf32> -> vector<16x32xf32>
    %c0_23 = arith.constant 0 : index
    %c0_24 = arith.constant 0 : index
    %40 = vector.load %arg9[%c0_23, %c0_24] : memref<1x32xf32, #tpu.memory_space<vmem>>, vector<1x32xf32>
    %41 = vector.broadcast %40 : vector<1x32xf32> to vector<16x32xf32>
    %42 = arith.addf %39, %41 : vector<16x32xf32>
    %43 = arith.truncf %42 : vector<16x32xf32> to vector<16x32xbf16>
    %44 = vector.extract_strided_slice %31 {offsets = [0, 0], sizes = [16, 8], strides = [1, 1]} : vector<16x32xbf16> to vector<16x8xbf16>
    %45 = vector.shape_cast %44 : vector<16x8xbf16> to vector<1x16x8xbf16>
    %46 = vector.extract_strided_slice %37 {offsets = [0, 0], sizes = [16, 8], strides = [1, 1]} : vector<16x32xbf16> to vector<16x8xbf16>
    %47 = vector.shape_cast %46 : vector<16x8xbf16> to vector<1x16x8xbf16>
    %48 = vector.extract_strided_slice %43 {offsets = [0, 0], sizes = [16, 8], strides = [1, 1]} : vector<16x32xbf16> to vector<16x8xbf16>
    %49 = vector.shape_cast %48 : vector<16x8xbf16> to vector<1x16x8xbf16>
    "tpu.trace_start"() <{level = 10 : i32, message = "bqd,bkd->bqk"}> : () -> ()
    %cst_25 = arith.constant dense<0.000000e+00> : vector<1x16x16xf32>
    %50 = tpu.matmul %45, %47, %cst_25 {dimension_numbers = #tpu.dot_dimension_numbers<[2], [2], [1], [1], [0, 0, 0, 1, 1, 1], [0], [0]>} : vector<1x16x8xbf16>, vector<1x16x8xbf16>, vector<1x16x16xf32> -> vector<1x16x16xf32>
    "tpu.trace_stop"() : () -> ()
    %cst_26 = arith.constant dense<0xFF800000> : vector<1x16xf32>
    %51 = vector.multi_reduction <maximumf>, %50, %cst_26 [2] : vector<1x16x16xf32> to vector<1x16xf32>
    %52 = vector.shape_cast %51 : vector<1x16xf32> to vector<1x16x1xf32>
    %53 = vector.broadcast %52 : vector<1x16x1xf32> to vector<1x16x16xf32>
    %54 = arith.subf %50, %53 : vector<1x16x16xf32>
    %55 = math.exp %54 : vector<1x16x16xf32>
    %cst_27 = arith.constant dense<0.000000e+00> : vector<1x16xf32>
    %56 = vector.multi_reduction <add>, %55, %cst_27 [2] : vector<1x16x16xf32> to vector<1x16xf32>
    %57 = vector.shape_cast %56 : vector<1x16xf32> to vector<1x16x1xf32>
    %58 = arith.truncf %55 : vector<1x16x16xf32> to vector<1x16x16xbf16>
    "tpu.trace_start"() <{level = 10 : i32, message = "bqk,bkd->bqd"}> : () -> ()
    %cst_28 = arith.constant dense<0.000000e+00> : vector<1x16x8xf32>
    %59 = tpu.matmul %58, %49, %cst_28 {dimension_numbers = #tpu.dot_dimension_numbers<[2], [1], [1], [2], [0, 0, 0, 1, 1, 2], [0], [0]>} : vector<1x16x16xbf16>, vector<1x16x8xbf16>, vector<1x16x8xf32> -> vector<1x16x8xf32>
    "tpu.trace_stop"() : () -> ()
    %60 = tpu.reciprocal %57 {approx = true} : vector<1x16x1xf32> -> vector<1x16x1xf32>
    %61 = vector.broadcast %60 : vector<1x16x1xf32> to vector<1x16x8xf32>
    %62 = arith.mulf %59, %61 : vector<1x16x8xf32>
    %63 = vector.shape_cast %62 : vector<1x16x8xf32> to vector<16x8xf32>
    %c0_29 = arith.constant 0 : index
    %c0_30 = arith.constant 0 : index
    %64 = vector.load %arg13[%c0_29, %c0_30] : memref<16x32xf32, #tpu.memory_space<vmem>>, vector<16x8xf32>
    tpu.vector_store %arg13[%c0_29, %c0_30], %63 {strides = array<i32>} : memref<16x32xf32, #tpu.memory_space<vmem>>, vector<16x8xf32>,
    %65 = vector.extract_strided_slice %31 {offsets = [0, 8], sizes = [16, 8], strides = [1, 1]} : vector<16x32xbf16> to vector<16x8xbf16>
    %66 = vector.shape_cast %65 : vector<16x8xbf16> to vector<1x16x8xbf16>
    %67 = vector.extract_strided_slice %37 {offsets = [0, 8], sizes = [16, 8], strides = [1, 1]} : vector<16x32xbf16> to vector<16x8xbf16>
    %68 = vector.shape_cast %67 : vector<16x8xbf16> to vector<1x16x8xbf16>
    %69 = vector.extract_strided_slice %43 {offsets = [0, 8], sizes = [16, 8], strides = [1, 1]} : vector<16x32xbf16> to vector<16x8xbf16>
    %70 = vector.shape_cast %69 : vector<16x8xbf16> to vector<1x16x8xbf16>
    "tpu.trace_start"() <{level = 10 : i32, message = "bqd,bkd->bqk"}> : () -> ()
    %cst_31 = arith.constant dense<0.000000e+00> : vector<1x16x16xf32>
    %71 = tpu.matmul %66, %68, %cst_31 {dimension_numbers = #tpu.dot_dimension_numbers<[2], [2], [1], [1], [0, 0, 0, 1, 1, 1], [0], [0]>} : vector<1x16x8xbf16>, vector<1x16x8xbf16>, vector<1x16x16xf32> -> vector<1x16x16xf32>
    "tpu.trace_stop"() : () -> ()
    %cst_32 = arith.constant dense<0xFF800000> : vector<1x16xf32>
    %72 = vector.multi_reduction <maximumf>, %71, %cst_32 [2] : vector<1x16x16xf32> to vector<1x16xf32>
    %73 = vector.shape_cast %72 : vector<1x16xf32> to vector<1x16x1xf32>
    %74 = vector.broadcast %73 : vector<1x16x1xf32> to vector<1x16x16xf32>
    %75 = arith.subf %71, %74 : vector<1x16x16xf32>
    %76 = math.exp %75 : vector<1x16x16xf32>
    %cst_33 = arith.constant dense<0.000000e+00> : vector<1x16xf32>
    %77 = vector.multi_reduction <add>, %76, %cst_33 [2] : vector<1x16x16xf32> to vector<1x16xf32>
    %78 = vector.shape_cast %77 : vector<1x16xf32> to vector<1x16x1xf32>
    %79 = arith.truncf %76 : vector<1x16x16xf32> to vector<1x16x16xbf16>
    "tpu.trace_start"() <{level = 10 : i32, message = "bqk,bkd->bqd"}> : () -> ()
    %cst_34 = arith.constant dense<0.000000e+00> : vector<1x16x8xf32>
    %80 = tpu.matmul %79, %70, %cst_34 {dimension_numbers = #tpu.dot_dimension_numbers<[2], [1], [1], [2], [0, 0, 0, 1, 1, 2], [0], [0]>} : vector<1x16x16xbf16>, vector<1x16x8xbf16>, vector<1x16x8xf32> -> vector<1x16x8xf32>
    "tpu.trace_stop"() : () -> ()
    %81 = tpu.reciprocal %78 {approx = true} : vector<1x16x1xf32> -> vector<1x16x1xf32>
    %82 = vector.broadcast %81 : vector<1x16x1xf32> to vector<1x16x8xf32>
    %83 = arith.mulf %80, %82 : vector<1x16x8xf32>
    %84 = vector.shape_cast %83 : vector<1x16x8xf32> to vector<16x8xf32>
    %c0_35 = arith.constant 0 : index
    %c8 = arith.constant 8 : index
    %85 = vector.load %arg13[%c0_35, %c8] : memref<16x32xf32, #tpu.memory_space<vmem>>, vector<16x8xf32>
    tpu.vector_store %arg13[%c0_35, %c8], %84 {strides = array<i32>} : memref<16x32xf32, #tpu.memory_space<vmem>>, vector<16x8xf32>,
    %86 = vector.extract_strided_slice %31 {offsets = [0, 16], sizes = [16, 8], strides = [1, 1]} : vector<16x32xbf16> to vector<16x8xbf16>
    %87 = vector.shape_cast %86 : vector<16x8xbf16> to vector<1x16x8xbf16>
    %88 = vector.extract_strided_slice %37 {offsets = [0, 16], sizes = [16, 8], strides = [1, 1]} : vector<16x32xbf16> to vector<16x8xbf16>
    %89 = vector.shape_cast %88 : vector<16x8xbf16> to vector<1x16x8xbf16>
    %90 = vector.extract_strided_slice %43 {offsets = [0, 16], sizes = [16, 8], strides = [1, 1]} : vector<16x32xbf16> to vector<16x8xbf16>
    %91 = vector.shape_cast %90 : vector<16x8xbf16> to vector<1x16x8xbf16>
    "tpu.trace_start"() <{level = 10 : i32, message = "bqd,bkd->bqk"}> : () -> ()
    %cst_36 = arith.constant dense<0.000000e+00> : vector<1x16x16xf32>
    %92 = tpu.matmul %87, %89, %cst_36 {dimension_numbers = #tpu.dot_dimension_numbers<[2], [2], [1], [1], [0, 0, 0, 1, 1, 1], [0], [0]>} : vector<1x16x8xbf16>, vector<1x16x8xbf16>, vector<1x16x16xf32> -> vector<1x16x16xf32>
    "tpu.trace_stop"() : () -> ()
    %cst_37 = arith.constant dense<0xFF800000> : vector<1x16xf32>
    %93 = vector.multi_reduction <maximumf>, %92, %cst_37 [2] : vector<1x16x16xf32> to vector<1x16xf32>
    %94 = vector.shape_cast %93 : vector<1x16xf32> to vector<1x16x1xf32>
    %95 = vector.broadcast %94 : vector<1x16x1xf32> to vector<1x16x16xf32>
    %96 = arith.subf %92, %95 : vector<1x16x16xf32>
    %97 = math.exp %96 : vector<1x16x16xf32>
    %cst_38 = arith.constant dense<0.000000e+00> : vector<1x16xf32>
    %98 = vector.multi_reduction <add>, %97, %cst_38 [2] : vector<1x16x16xf32> to vector<1x16xf32>
    %99 = vector.shape_cast %98 : vector<1x16xf32> to vector<1x16x1xf32>
    %100 = arith.truncf %97 : vector<1x16x16xf32> to vector<1x16x16xbf16>
    "tpu.trace_start"() <{level = 10 : i32, message = "bqk,bkd->bqd"}> : () -> ()
    %cst_39 = arith.constant dense<0.000000e+00> : vector<1x16x8xf32>
    %101 = tpu.matmul %100, %91, %cst_39 {dimension_numbers = #tpu.dot_dimension_numbers<[2], [1], [1], [2], [0, 0, 0, 1, 1, 2], [0], [0]>} : vector<1x16x16xbf16>, vector<1x16x8xbf16>, vector<1x16x8xf32> -> vector<1x16x8xf32>
    "tpu.trace_stop"() : () -> ()
    %102 = tpu.reciprocal %99 {approx = true} : vector<1x16x1xf32> -> vector<1x16x1xf32>
    %103 = vector.broadcast %102 : vector<1x16x1xf32> to vector<1x16x8xf32>
    %104 = arith.mulf %101, %103 : vector<1x16x8xf32>
    %105 = vector.shape_cast %104 : vector<1x16x8xf32> to vector<16x8xf32>
    %c0_40 = arith.constant 0 : index
    %c16 = arith.constant 16 : index
    %106 = vector.load %arg13[%c0_40, %c16] : memref<16x32xf32, #tpu.memory_space<vmem>>, vector<16x8xf32>
    tpu.vector_store %arg13[%c0_40, %c16], %105 {strides = array<i32>} : memref<16x32xf32, #tpu.memory_space<vmem>>, vector<16x8xf32>,
    %107 = vector.extract_strided_slice %31 {offsets = [0, 24], sizes = [16, 8], strides = [1, 1]} : vector<16x32xbf16> to vector<16x8xbf16>
    %108 = vector.shape_cast %107 : vector<16x8xbf16> to vector<1x16x8xbf16>
    %109 = vector.extract_strided_slice %37 {offsets = [0, 24], sizes = [16, 8], strides = [1, 1]} : vector<16x32xbf16> to vector<16x8xbf16>
    %110 = vector.shape_cast %109 : vector<16x8xbf16> to vector<1x16x8xbf16>
    %111 = vector.extract_strided_slice %43 {offsets = [0, 24], sizes = [16, 8], strides = [1, 1]} : vector<16x32xbf16> to vector<16x8xbf16>
    %112 = vector.shape_cast %111 : vector<16x8xbf16> to vector<1x16x8xbf16>
    "tpu.trace_start"() <{level = 10 : i32, message = "bqd,bkd->bqk"}> : () -> ()
    %cst_41 = arith.constant dense<0.000000e+00> : vector<1x16x16xf32>
    %113 = tpu.matmul %108, %110, %cst_41 {dimension_numbers = #tpu.dot_dimension_numbers<[2], [2], [1], [1], [0, 0, 0, 1, 1, 1], [0], [0]>} : vector<1x16x8xbf16>, vector<1x16x8xbf16>, vector<1x16x16xf32> -> vector<1x16x16xf32>
    "tpu.trace_stop"() : () -> ()
    %cst_42 = arith.constant dense<0xFF800000> : vector<1x16xf32>
    %114 = vector.multi_reduction <maximumf>, %113, %cst_42 [2] : vector<1x16x16xf32> to vector<1x16xf32>
    %115 = vector.shape_cast %114 : vector<1x16xf32> to vector<1x16x1xf32>
    %116 = vector.broadcast %115 : vector<1x16x1xf32> to vector<1x16x16xf32>
    %117 = arith.subf %113, %116 : vector<1x16x16xf32>
    %118 = math.exp %117 : vector<1x16x16xf32>
    %cst_43 = arith.constant dense<0.000000e+00> : vector<1x16xf32>
    %119 = vector.multi_reduction <add>, %118, %cst_43 [2] : vector<1x16x16xf32> to vector<1x16xf32>
    %120 = vector.shape_cast %119 : vector<1x16xf32> to vector<1x16x1xf32>
    %121 = arith.truncf %118 : vector<1x16x16xf32> to vector<1x16x16xbf16>
    "tpu.trace_start"() <{level = 10 : i32, message = "bqk,bkd->bqd"}> : () -> ()
    %cst_44 = arith.constant dense<0.000000e+00> : vector<1x16x8xf32>
    %122 = tpu.matmul %121, %112, %cst_44 {dimension_numbers = #tpu.dot_dimension_numbers<[2], [1], [1], [2], [0, 0, 0, 1, 1, 2], [0], [0]>} : vector<1x16x16xbf16>, vector<1x16x8xbf16>, vector<1x16x8xf32> -> vector<1x16x8xf32>
    "tpu.trace_stop"() : () -> ()
    %123 = tpu.reciprocal %120 {approx = true} : vector<1x16x1xf32> -> vector<1x16x1xf32>
    %124 = vector.broadcast %123 : vector<1x16x1xf32> to vector<1x16x8xf32>
    %125 = arith.mulf %122, %124 : vector<1x16x8xf32>
    %126 = vector.shape_cast %125 : vector<1x16x8xf32> to vector<16x8xf32>
    %c0_45 = arith.constant 0 : index
    %c24 = arith.constant 24 : index
    %127 = vector.load %arg13[%c0_45, %c24] : memref<16x32xf32, #tpu.memory_space<vmem>>, vector<16x8xf32>
    tpu.vector_store %arg13[%c0_45, %c24], %126 {strides = array<i32>} : memref<16x32xf32, #tpu.memory_space<vmem>>, vector<16x8xf32>,
    %c0_46 = arith.constant 0 : index
    %c0_47 = arith.constant 0 : index
    %128 = vector.load %arg13[%c0_46, %c0_47] : memref<16x32xf32, #tpu.memory_space<vmem>>, vector<16x32xf32>
    %129 = arith.truncf %128 : vector<16x32xf32> to vector<16x32xbf16>
    %c0_48 = arith.constant 0 : index
    %c0_49 = arith.constant 0 : index
    %130 = vector.load %arg10[%c0_48, %c0_49] : memref<32x32xbf16, #tpu.memory_space<vmem>>, vector<32x32xbf16>
    %cst_50 = arith.constant dense<0.000000e+00> : vector<16x32xf32>
    %131 = tpu.matmul %129, %130, %cst_50 {dimension_numbers = #tpu.dot_dimension_numbers<[1], [0], [0], [1], [0, 0, 1, 1], [], []>} : vector<16x32xbf16>, vector<32x32xbf16>, vector<16x32xf32> -> vector<16x32xf32>
    %c0_51 = arith.constant 0 : index
    %c0_52 = arith.constant 0 : index
    %132 = vector.load %arg11[%c0_51, %c0_52] : memref<1x32xf32, #tpu.memory_space<vmem>>, vector<1x32xf32>
    %133 = vector.broadcast %132 : vector<1x32xf32> to vector<16x32xf32>
    %134 = arith.addf %131, %133 : vector<16x32xf32>
    %135 = vector.shape_cast %134 : vector<16x32xf32> to vector<1x16x32xf32>
    %136 = tpu.transpose %135, [0, 2, 1] : vector<1x16x32xf32> -> vector<1x32x16xf32>
    %c0_53 = arith.constant 0 : index
    %c0_54 = arith.constant 0 : index
    %c0_55 = arith.constant 0 : index
    %137 = vector.load %arg12[%c0_53, %c0_54, %c0_55] : memref<1x32x16xf32, #tpu.memory_space<vmem>>, vector<1x32x16xf32>
    tpu.vector_store %arg12[%c0_53, %c0_54, %c0_55], %136 {strides = array<i32>} : memref<1x32x16xf32, #tpu.memory_space<vmem>>, vector<1x32x16xf32>,
    return
  }
  func.func @transform_0(%arg0: i32) -> (i32, i32, i32) {
    %c0_i32 = arith.constant 0 : i32
    %c0_i32_0 = arith.constant 0 : i32
    %c0_i32_1 = arith.constant 0 : i32
    return %arg0, %c0_i32, %c0_i32_0 : i32, i32, i32
  }
  func.func @transform_1(%arg0: i32) -> (i32, i32) {
    %c0_i32 = arith.constant 0 : i32
    %c0_i32_0 = arith.constant 0 : i32
    %c0_i32_1 = arith.constant 0 : i32
    return %c0_i32, %c0_i32_0 : i32, i32
  }
  func.func @transform_2(%arg0: i32) -> (i32, i32) {
    %c0_i32 = arith.constant 0 : i32
    %c0_i32_0 = arith.constant 0 : i32
    %c0_i32_1 = arith.constant 0 : i32
    return %c0_i32, %c0_i32_0 : i32, i32
  }
  func.func @transform_3(%arg0: i32) -> (i32, i32) {
    %c0_i32 = arith.constant 0 : i32
    %c0_i32_0 = arith.constant 0 : i32
    %c0_i32_1 = arith.constant 0 : i32
    return %c0_i32, %c0_i32_0 : i32, i32
  }
  func.func @transform_4(%arg0: i32) -> (i32, i32) {
    %c0_i32 = arith.constant 0 : i32
    %c0_i32_0 = arith.constant 0 : i32
    %c0_i32_1 = arith.constant 0 : i32
    return %c0_i32, %c0_i32_0 : i32, i32
  }
  func.func @transform_5(%arg0: i32) -> (i32, i32) {
    %c0_i32 = arith.constant 0 : i32
    %c0_i32_0 = arith.constant 0 : i32
    %c0_i32_1 = arith.constant 0 : i32
    return %c0_i32, %c0_i32_0 : i32, i32
  }
  func.func @transform_6(%arg0: i32) -> (i32, i32) {
    %c0_i32 = arith.constant 0 : i32
    %c0_i32_0 = arith.constant 0 : i32
    %c0_i32_1 = arith.constant 0 : i32
    return %c0_i32, %c0_i32_0 : i32, i32
  }
  func.func @transform_7(%arg0: i32) -> (i32, i32) {
    %c0_i32 = arith.constant 0 : i32
    %c0_i32_0 = arith.constant 0 : i32
    %c0_i32_1 = arith.constant 0 : i32
    return %c0_i32, %c0_i32_0 : i32, i32
  }
  func.func @transform_8(%arg0: i32) -> (i32, i32) {
    %c0_i32 = arith.constant 0 : i32
    %c0_i32_0 = arith.constant 0 : i32
    %c0_i32_1 = arith.constant 0 : i32
    return %c0_i32, %c0_i32_0 : i32, i32
  }
  func.func @transform_9(%arg0: i32) -> (i32, i32) {
    %c0_i32 = arith.constant 0 : i32
    %c0_i32_0 = arith.constant 0 : i32
    %c0_i32_1 = arith.constant 0 : i32
    return %c0_i32, %c0_i32_0 : i32, i32
  }
  func.func @transform_10(%arg0: i32) -> (i32, i32) {
    %c0_i32 = arith.constant 0 : i32
    %c0_i32_0 = arith.constant 0 : i32
    %c0_i32_1 = arith.constant 0 : i32
    return %c0_i32, %c0_i32_0 : i32, i32
  }
  func.func @transform_11(%arg0: i32) -> (i32, i32, i32) {
    %c0_i32 = arith.constant 0 : i32
    %c0_i32_0 = arith.constant 0 : i32
    %c0_i32_1 = arith.constant 0 : i32
    return %arg0, %c0_i32, %c0_i32_0 : i32, i32, i32
  }
}

</mosaic_0001>

<bundles_post_ra>
// kernel: tpu_custom_call.1
= control target key start
LH: loop header
LB: loop body
LE: loop exit
PB: predicated region body
PF: predicated region fallthrough
CT: control target
= control target key end

     0   :  { %s1630_s17 = smov 0   ;;  %s1805_s0 = inlined_call_operand.vmem [shape: f32[2,32,16], index: 0, kind: input, shape index: {}]   ;;  %s1806_s1 = inlined_call_operand.vmem [shape: f32[1,32], index: 1, kind: input, shape index: {}]   ;;  %s1807_s2 = inlined_call_operand.vmem [shape: f32[1,32], index: 2, kind: input, shape index: {}]   ;;  %s1808_s3 = inlined_call_operand.vmem [shape: bf16[32,32], index: 3, kind: input, shape index: {}]   ;;  %s1809_s4 = inlined_call_operand.vmem [shape: f32[1,32], index: 4, kind: input, shape index: {}]   ;;  %s1810_s5 = inlined_call_operand.vmem [shape: bf16[32,32], index: 5, kind: input, shape index: {}]   ;;  %s1811_s6 = inlined_call_operand.vmem [shape: f32[1,32], index: 6, kind: input, shape index: {}]   ;;  %s1812_s7 = inlined_call_operand.vmem [shape: bf16[32,32], index: 7, kind: input, shape index: {}]   ;;  %s1813_s8 = inlined_call_operand.vmem [shape: f32[1,32], index: 8, kind: input, shape index: {}]   ;;  %s1814_s9 = inlined_call_operand.vmem [shape: bf16[32,32], index: 9, kind: input, shape index: {}]   ;;  %s1815_s10 = inlined_call_operand.vmem [shape: f32[1,32], index: 10, kind: input, shape index: {}]   ;;  %s1816_s11 = inlined_call_operand.vmem [shape: f32[2,32,16], index: 11, kind: output, shape index: {}]  }
   0x1 LB: > { %s1347_s18 = sadd.s32 4294967295, %s1560_s17   ;;  %p1351_p0 = scmp.ge.s32.totalorder %s1560_s17, 1  ;;  %s1560_s17 = sphi %s1630_s17, %s21_s17  }
   0x2   : > { %p337_p1 = scmp.lt.s32.totalorder %s1560_s17, 3 }
   0x4   : > { %p338_p2 = pnand %p1351_p0, %p337_p1 }
   0x5   : > { %p377_p3 = scmp.lt.s32.totalorder (!%p338_p2), %s1347_s18, 1  ;;  %s1564_s27 = smov (!%p338_p2), 120  }
   0x6   : > { %341 = sbr.rel (%p338_p2) target bundleno = 1848 (0x738), region = 64  ;;  %s1565_s30 = smov (!%p338_p2), 112  }
   0x7   : > { %s1566_s12 = smov (!%p338_p2), 104   ;;  %s1567_s13 = smov (!%p338_p2), 8  }
   0x8   : > { %s1568_s16 = smov (!%p338_p2), 16  }
   0xb   : > { %s1818_s18 = smov (!%p377_p3, %s1347_s18), 1  ;;  %vm424_vm0 = vcmask 261120   ;;  %v1510_v18 = vld [vmem:[%s1808_s3 + $0x8] sm:$0xff]   ;;  %v1562_v20 = vmov 0.0   ;;  %v1512_v21 = vld [vmem:[%s1808_s3] sm:$0xff]   ;;  %vm1563_vm1 = vmmov 0  }
   0xc   : > { %s1384_s19 = sshll.u32 %s1818_s18, 5  ;;  %v1511_v19 = vld [vmem:[%s1810_s5 + $0x8] sm:$0xff]   ;;  %1414 = vmatprep.subr.bf16.mxu0 %v1562_v20  ;;  %1422 = vmatprep.subr.bf16.mxu1 %v1562_v20  ;;  %v1513_v22 = vld [vmem:[%s1810_s5] sm:$0xff]   ;;  %vm669_vm2 = vcmask 64512   ;;  %vm717_vm3 = vcmask 130048   ;;  %vm919_vm4 = vcmask 130112  }
   0xd   : > { %s381_s22 = scalar_lea.vmem %s1805_s0, %s1384_s19  ;;  %1415 = vmatpush3.bf16.msra.mxu0 %v1510_v18  ;;  %1423 = vmatpush3.bf16.msra.mxu1 %v1511_v19  ;;  %v1356_v31 = vld [vmem:[%s1806_s1] ss:$0 sm:$0xff]  ;;  %v1514_v39 = vld [vmem:[%s1812_s7 + $0x8] sm:$0xff]   ;;  %vm1051_vm5 = vcmask 195712   ;;  %vm1183_vm6 = vcmask 261312  }
   0xe   : > { %v388_v0 = vld [vmem:[%s381_s22] sm:$0xff]  ;;  %v389_v1 = vld [vmem:[%s381_s22 + $0x8] sm:$0xff]  ;;  %v390_v2 = vld [vmem:[%s381_s22 + $0x10] sm:$0xff]  ;;  %1416 = vmatprep.subr.bf16.mxu0 %v1562_v20  ;;  %1424 = vmatprep.subr.bf16.mxu1 %v1562_v20 }
   0xf   : > { %392 = vxpose.xlu0.b32.start [1/4] (short) (narrow) %v388_v0, 16  ;;  %v391_v3 = vld [vmem:[%s381_s22 + $0x18] sm:$0xff]  ;;  %1418 = vmatprep.mubr.msk.bf16.mxu0 %vm1563_vm1, %v1562_v20  ;;  %v1357_v35 = vld [vmem:[%s1807_s2] ss:$0 sm:$0xff]  ;;  %s1569_s22 = smov 24  }
  0x10   : > { %1426 = vmatprep.mubr.msk.bf16.mxu1 %vm1563_vm1, %v1562_v20  ;;  %v1515_v41 = vld [vmem:[%s1812_s7] sm:$0xff]  }
  0x11   : > { %1417 = vmatpush3.bf16.msra.mxu0 %v1512_v21  ;;  %1425 = vmatpush3.bf16.msra.mxu1 %v1513_v22  ;;  %v1358_v44 = vld [vmem:[%s1809_s4] ss:$0 sm:$0xff] }
  0x12   : > { %1430 = vmatprep.subr.bf16.mxu0 %v1562_v20  ;;  %1438 = vmatprep.subr.bf16.mxu1 %v1562_v20  ;;  %v1362_v45 = vld [vmem:[%s1811_s6] ss:$0 sm:$0xff] }
  0x13   : > { %393 = vxpose.xlu0.b32.cont [2/4] (short) (narrow) %v389_v1, 16  ;;  %v1366_v60 = vld [vmem:[%s1813_s8] ss:$0 sm:$0xff] }
  0x17   : > { %394 = vxpose.xlu0.b32.cont [3/4] (short) (narrow) %v390_v2, 16 }
  0x1b   : > { %395 = vxpose.xlu0.b32.end [4/4] (short) (narrow) %v391_v3, 16 }
  0x8b   : > { %v408_v4 = vpop.trf.xlu0 }
  0x8c   : > { %v425_v5 = vsel %vm424_vm0, %v408_v4, 0.0 }
  0x8d   : > { %426 = vadd.xlane.f32.xlu1 %v425_v5 }
  0x8f   : > { %v409_v6 = vpop.trf.xlu0 }
  0x90   : > { %v428_v7 = vsel %vm424_vm0, %v409_v6, 0.0 }
  0x91   : > { %429 = vadd.xlane.f32.xlu1 %v428_v7 }
 0x116   : > { %v427_v8 = vpop.xlane.xlu1 %426 }
 0x117   : > { %v432_v9 = vmul.f32 0.03125, %v427_v8 }
 0x119   : > { %v434_v10 = vsub.f32 %v408_v4, %v432_v9 }
 0x11a   : > { %v430_v11 = vpop.xlane.xlu1 %429 }
 0x11b   : > { %v433_v12 = vmul.f32 0.03125, %v430_v11  ;;  %v436_v13 = vmul.f32 %v434_v10, %v434_v10 }
 0x11d   : > { %v435_v14 = vsub.f32 %v409_v6, %v433_v12  ;;  %v438_v15 = vsel %vm424_vm0, %v436_v13, 0.0 }
 0x11e   : > { %439 = vadd.xlane.f32.xlu1 %v438_v15 }
 0x11f   : > { %v437_v16 = vmul.f32 %v435_v14, %v435_v14 }
 0x121   : > { %v441_v17 = vsel %vm424_vm0, %v437_v16, 0.0 }
 0x122   : > { %442 = vadd.xlane.f32.xlu1 %v441_v17 }
 0x1a7   : > { %v440_v23 = vpop.xlane.xlu1 %439 }
 0x1a8   : > { %v444_v24 = vmul.f32 0.03125, %v440_v23 }
 0x1aa   : > { %v446_v25 = vadd.f32 1e-05, %v444_v24 }
 0x1ab   : > { %v443_v26 = vpop.xlane.xlu1 %442 }
 0x1ac   : > { %1518 = vrsqrt.f32 %v446_v25  ;;  %v445_v27 = vmul.f32 0.03125, %v443_v26 }
 0x1ae   : > { %v447_v28 = vadd.f32 1e-05, %v445_v27 }
 0x1b0   : > { %1520 = vrsqrt.f32 %v447_v28 }
 0x1b9   : > { %v1519_v29 = vpop.eup %1518 }
 0x1ba   : > { %v450_v30 = vmul.f32 %v1519_v29, %v434_v10 }
 0x1bc   : > { %v459_v34 = vmul.f32 %v1356_v31, %v450_v30 }
 0x1bd   : > { %v1521_v32 = vpop.eup %1520 }
 0x1be   : > { %v451_v33 = vmul.f32 %v1521_v32, %v435_v14  ;;  %v468_v37 = vadd.f32 %v1357_v35, %v459_v34 }
 0x1c0   : > { %v460_v36 = vmul.f32 %v1356_v31, %v451_v33 }
 0x1c2   : > { %v469_v38 = vadd.f32 %v1357_v35, %v460_v36 }
 0x1c4   : > { %v470_v40 = vpack.c.bf16 %v469_v38, %v468_v37 }
 0x1c6   : > { %1419 = vmatmul.mubr.msk.bf16.vlgmr.msra.gmra.mxu0 %vm424_vm0, %v470_v40  ;;  %1427 = vmatmul.mubr.msk.bf16.vlgmr.msra.gmra.mxu1 %vm424_vm0, %v470_v40 }
 0x1c7   : > { %1431 = vmatpush3.bf16.msra.mxu0 %v1514_v39  ;;  %1434 = vmatprep.mubr.msk.bf16.mxu0 %vm1563_vm1, %v1562_v20 }
 0x1c8   : > { %1432 = vmatprep.subr.bf16.mxu0 %v1562_v20  ;;  %1440 = vmatprep.mubr.msk.bf16.mxu1 %vm1563_vm1, %v1562_v20 }
 0x1cb   : > { %1433 = vmatpush3.bf16.msra.mxu0 %v1515_v41 }
 0x1cc   : > { %1444 = vmatprep.subr.bf16.mxu0 %v1562_v20 }
 0x1ce   : > { %1435 = vmatmul.mubr.msk.bf16.vlgmr.msra.gmra.mxu0 %vm424_vm0, %v470_v40 }
 0x1cf   : > { %1446 = vmatprep.mubr.msk.bf16.mxu0 %vm1563_vm1, %v1562_v20 }
 0x286   : > { %v531_v42 = vpop.f32.mrf.mxu0  ;;  %v596_v43 = vpop.f32.mrf.mxu1 }
 0x287   : > { %v532_v50 = vadd.f32 %v1358_v44, %v531_v42  ;;  %v597_v51 = vadd.f32 %v1362_v45, %v596_v43 }
 0x288   : > { %v1420_v46 = vpop.f32.mrf.mxu0  ;;  %v1428_v47 = vpop.f32.mrf.mxu1 }
 0x28a   : > { %v534_v48 = vpop.f32.mrf.mxu0  ;;  %v599_v49 = vpop.f32.mrf.mxu1 }
 0x28b   : > { %v535_v52 = vadd.f32 %v1358_v44, %v534_v48  ;;  %v600_v53 = vadd.f32 %v1362_v45, %v599_v49 }
 0x28c   : > { %v1421_v54 = vpop.f32.mrf.mxu0  ;;  %v1429_v55 = vpop.f32.mrf.mxu1 }
 0x28d   : > { %v538_v56 = vpack.c.bf16 %v535_v52, %v532_v50  ;;  %v603_v57 = vpack.c.bf16 %v600_v53, %v597_v51 }
 0x28e   : > { %v661_v58 = vpop.f32.mrf.mxu0 }
 0x28f   : > { %791 = vrot.lane.b32.xlu0 %v603_v57, %s1564_s27  ;;  %788 = vrot.lane.b32.xlu1 %v538_v56, %s1564_s27  ;;  %v674_v59 = vsel %vm669_vm2, %v603_v57, 0  ;;  %v662_v63 = vadd.f32 %v1366_v60, %v661_v58 }
 0x290   : > { %v1436_v61 = vpop.f32.mrf.mxu0  ;;  %1439 = vmatpush3.bf16.xpose.msra.mxu1 %v674_v59 }
 0x291   : > { %1450 = vmatprep.subr.bf16.mxu1 %v1562_v20 }
 0x292   : > { %v664_v62 = vpop.f32.mrf.mxu0 }
 0x293   : > { %v665_v0 = vadd.f32 %v1366_v60, %v664_v62  ;;  %924 = vrot.lane.b32.xlu1 %v603_v57, %s1565_s30 }
 0x294   : > { %v1437_v1 = vpop.f32.mrf.mxu0 }
 0x295   : > { %v1709_v2 = vpack.c.bf16 %v665_v0, %v662_v63 }
 0x297   : > { %922 = vrot.lane.b32.xlu1 %v538_v56, %s1565_s30  ;;  %1441 = vmatmul.mubr.msk.bf16.vlgmr.msra.gmra.mxu1 %vm669_vm2, %v538_v56 }
 0x298   : > { %1445 = vmatpush3.bf16.msra.mxu0 %v1709_v2  ;;  %1452 = vmatprep.mubr.msk.bf16.mxu1 %vm1563_vm1, %v1562_v20 }
 0x299   : > { %1456 = vmatprep.subr.bf16.mxu0 %v1562_v20 }
 0x29b   : > { %1056 = vrot.lane.b32.xlu1 %v603_v57, %s1566_s12 }
 0x29f   : > { %1054 = vrot.lane.b32.xlu1 %v538_v56, %s1566_s12 }
 0x301   : > { %v792_v3 = vpop.permute.xlu0 %791  ;;  %v789_v4 = vpop.permute.xlu1 %788 }
 0x302   : > { %v797_v5 = vsel %vm669_vm2, %v792_v3, 0 }
 0x303   : > { %1451 = vmatpush3.bf16.xpose.msra.mxu1 %v797_v5 }
 0x304   : > { %1462 = vmatprep.subr.bf16.mxu1 %v1562_v20 }
 0x305   : > { %v925_v6 = vpop.permute.xlu1 %924 }
 0x306   : > { %v930_v8 = vsel %vm669_vm2, %v925_v6, 0 }
 0x309   : > { %v923_v7 = vpop.permute.xlu1 %922 }
 0x30a   : > { %1453 = vmatmul.mubr.msk.bf16.vlgmr.msra.gmra.mxu1 %vm669_vm2, %v789_v4 }
 0x30b   : > { %1463 = vmatpush3.bf16.xpose.msra.mxu1 %v930_v8  ;;  %1464 = vmatprep.mubr.msk.bf16.mxu1 %vm1563_vm1, %v1562_v20 }
 0x30c   : > { %1474 = vmatprep.subr.bf16.mxu1 %v1562_v20 }
 0x30d   : > { %v1057_v9 = vpop.permute.xlu1 %1056 }
 0x30e   : > { %v1062_v10 = vsel %vm669_vm2, %v1057_v9, 0 }
 0x311   : > { %v1055_v11 = vpop.permute.xlu1 %1054 }
 0x312   : > { %1465 = vmatmul.mubr.msk.bf16.vlgmr.msra.gmra.mxu1 %vm669_vm2, %v923_v7 }
 0x313   : > { %1475 = vmatpush3.bf16.xpose.msra.mxu1 %v1062_v10  ;;  %1476 = vmatprep.mubr.msk.bf16.mxu1 %vm1563_vm1, %v1562_v20 }
 0x314   : > { %1486 = vmatprep.subr.bf16.mxu1 %v1562_v20 }
 0x31a   : > { %1477 = vmatmul.mubr.msk.bf16.vlgmr.msra.gmra.mxu1 %vm669_vm2, %v1055_v11 }
 0x31b   : > { %1490 = vmatprep.mubr.msk.bf16.mxu1 %vm1563_vm1, %v1562_v20 }
 0x357   : > { %v710_v12 = vpop.f32.mrf.mxu1 }
 0x358   : > { %v718_v13 = vsel %vm717_vm3, %v710_v12, -inf }
 0x359   : > { %719 = vmax.xlane.f32.xlu1 %v718_v13  ;;  %v1442_v14 = vpop.f32.mrf.mxu1 }
 0x35b   : > { %v713_v15 = vpop.f32.mrf.mxu1 }
 0x35c   : > { %v721_v16 = vsel %vm717_vm3, %v713_v15, -inf }
 0x35d   : > { %722 = vmax.xlane.f32.xlu0 %v721_v16  ;;  %v1443_v17 = vpop.f32.mrf.mxu1 }
 0x3ca   : > { %v833_v18 = vpop.f32.mrf.mxu1 }
 0x3cb   : > { %v840_v19 = vsel %vm717_vm3, %v833_v18, -inf }
 0x3cc   : > { %841 = vmax.xlane.f32.xlu1 %v840_v19  ;;  %v1454_v21 = vpop.f32.mrf.mxu1 }
 0x3ce   : > { %v836_v22 = vpop.f32.mrf.mxu1 }
 0x3cf   : > { %v843_v23 = vsel %vm717_vm3, %v836_v22, -inf }
 0x3d0   : > { %844 = vmax.xlane.f32.xlu0 %v843_v23  ;;  %v1455_v24 = vpop.f32.mrf.mxu1 }
 0x3d2   : > { %v1738_v25 = vpop.f32.mrf.mxu1 }
 0x3d3   : > { %v973_v44 = vsel %vm717_vm3, %v1738_v25, -inf }
 0x3d4   : > { %v1466_v26 = vpop.f32.mrf.mxu1 }
 0x3d6   : > { %v969_v27 = vpop.f32.mrf.mxu1 }
 0x3d7   : > { %v976_v28 = vsel %vm717_vm3, %v969_v27, -inf }
 0x3d8   : > { %977 = vmax.xlane.f32.xlu0 %v976_v28  ;;  %v1467_v29 = vpop.f32.mrf.mxu1 }
 0x3da   : > { %v1741_v30 = vpop.f32.mrf.mxu1 }
 0x3db   : > { %v1105_v45 = vsel %vm717_vm3, %v1741_v30, -inf }
 0x3dc   : > { %v1478_v31 = vpop.f32.mrf.mxu1 }
 0x3dd   : > { %860 = vrot.lane.b32.xlu1 %v1709_v2, %s1564_s27  ;;  %s386_s27 = scalar_lea.vmem %s1816_s11, %s1384_s19 }
 0x3de   : > { %v1101_v32 = vpop.f32.mrf.mxu1 }
 0x3df   : > { %v1108_v33 = vsel %vm717_vm3, %v1101_v32, -inf }
 0x3e0   : > { %1109 = vmax.xlane.f32.xlu0 %v1108_v33  ;;  %v1479_v34 = vpop.f32.mrf.mxu1 }
 0x3e2   : > { %v720_v35 = vpop.xlane.xlu1 %719 }
 0x3e3   : > { %v724_v36 = vsub.f32 %v710_v12, %v720_v35 }
 0x3e5   : > { %v726_v37 = vmul.f32 1.442695, %v724_v36 }
 0x3e6   : > { %v723_v38 = vpop.xlane.xlu0 %722 }
 0x3e7   : > { %v725_v39 = vsub.f32 %v713_v15, %v723_v38  ;;  %1522 = vpow2.f32 %v726_v37 }
 0x3e9   : > { %v728_v40 = vmul.f32 1.442695, %v725_v39 }
 0x3eb   : > { %1524 = vpow2.f32 %v728_v40 }
 0x3f4   : > { %v1748_v41 = vpop.eup %1522 }
 0x3f6   : > { %992 = vrot.lane.b32.xlu0 %v1709_v2, %s1565_s30 }
 0x3f8   : > { %v1525_v42 = vpop.eup %1524 }
 0x3f9   : > { %v736_v43 = vpack.c.bf16 %v1525_v42, %v1748_v41  ;;  %v733_v5 = vsel %vm717_vm3, %v1525_v42, 0.0 }
 0x3fb   : > { %1447 = vmatmul.mubr.msk.bf16.vlgmr.msra.gmra.mxu0 %vm717_vm3, %v736_v43 }
 0x3fc   : > { %1458 = vmatprep.mubr.msk.bf16.mxu0 %vm1563_vm1, %v1562_v20 }
 0x401   : > { %974 = vmax.xlane.f32.xlu1 %v973_v44 }
 0x405   : > { %1106 = vmax.xlane.f32.xlu1 %v1105_v45 }
 0x416   : > { %1124 = vrot.lane.b32.xlu1 %v1709_v2, %s1566_s12 }
 0x455   : > { %v842_v46 = vpop.xlane.xlu1 %841 }
 0x456   : > { %v846_v47 = vsub.f32 %v833_v18, %v842_v46  ;;  %v730_v18 = vsel %vm717_vm3, %v1748_v41, 0.0 }
 0x458   : > { %v848_v48 = vmul.f32 1.442695, %v846_v47 }
 0x459   : > { %v845_v49 = vpop.xlane.xlu0 %844  ;;  %v861_v50 = vpop.permute.xlu1 %860 }
 0x45a   : > { %1526 = vpow2.f32 %v848_v48  ;;  %v847_v51 = vsub.f32 %v836_v22, %v845_v49  ;;  %1457 = vmatpush3.bf16.msra.mxu0 %v861_v50  ;;  %v1516_v49 = vld [vmem:[%s1814_s9 + $0x8] sm:$0xff]  }
 0x45b   : > { %1468 = vmatprep.subr.bf16.mxu0 %v1562_v20  ;;  %1487 = vmatpush3.bf16.msra.mxu1 %v1516_v49 }
 0x45c   : > { %v850_v52 = vmul.f32 1.442695, %v847_v51  ;;  %1488 = vmatprep.subr.bf16.mxu1 %v1562_v20 }
 0x45e   : > { %1528 = vpow2.f32 %v850_v52  ;;  %v1517_v52 = vld [vmem:[%s1814_s9] sm:$0xff]  }
 0x45f   : > { %1489 = vmatpush3.bf16.msra.mxu1 %v1517_v52 }
 0x461   : > { %v978_v53 = vpop.xlane.xlu0 %977 }
 0x462   : > { %v980_v54 = vsub.f32 %v969_v27, %v978_v53 }
 0x464   : > { %v983_v55 = vmul.f32 1.442695, %v980_v54 }
 0x466   : > { %1530 = vpow2.f32 %v983_v55 }
 0x467   : > { %v1527_v56 = vpop.eup %1526 }
 0x468   : > { %v852_v57 = vsel %vm717_vm3, %v1527_v56, 0.0 }
 0x469   : > { %v1110_v58 = vpop.xlane.xlu0 %1109  ;;  %853 = vadd.xlane.f32.xlu1 %v852_v57 }
 0x46a   : > { %v1112_v59 = vsub.f32 %v1101_v32, %v1110_v58 }
 0x46b   : > { %v1529_v60 = vpop.eup %1528 }
 0x46c   : > { %v1115_v61 = vmul.f32 1.442695, %v1112_v59  ;;  %v855_v62 = vsel %vm717_vm3, %v1529_v60, 0.0  ;;  %v858_v63 = vpack.c.bf16 %v1529_v60, %v1527_v56 }
 0x46d   : > { %856 = vadd.xlane.f32.xlu0 %v855_v62  ;;  %v993_v0 = vpop.permute.xlu0 %992 }
 0x46e   : > { %1532 = vpow2.f32 %v1115_v61  ;;  %1459 = vmatmul.mubr.msk.bf16.vlgmr.msra.gmra.mxu0 %vm717_vm3, %v858_v63 }
 0x46f   : > { %1469 = vmatpush3.bf16.msra.mxu0 %v993_v0  ;;  %1470 = vmatprep.mubr.msk.bf16.mxu0 %vm1563_vm1, %v1562_v20 }
 0x470   : > { %1480 = vmatprep.subr.bf16.mxu0 %v1562_v20 }
 0x473   : > { %v1531_v1 = vpop.eup %1530 }
 0x474   : > { %v988_v2 = vsel %vm717_vm3, %v1531_v1, 0.0 }
 0x475   : > { %989 = vadd.xlane.f32.xlu1 %v988_v2 }
 0x47b   : > { %v1533_v3 = vpop.eup %1532 }
 0x47c   : > { %v1120_v4 = vsel %vm717_vm3, %v1533_v3, 0.0 }
 0x47d   : > { %1121 = vadd.xlane.f32.xlu1 %v1120_v4 }
 0x481   : > { %734 = vadd.xlane.f32.xlu1 %v733_v5 }
 0x48a   : > { %v975_v6 = vpop.xlane.xlu1 %974 }
 0x48b   : > { %v979_v7 = vsub.f32 %v1738_v25, %v975_v6 }
 0x48d   : > { %v981_v8 = vmul.f32 1.442695, %v979_v7  ;;  %v1378_v7 = vld [vmem:[%s1815_s10] ss:$0 sm:$0xff] }
 0x48e   : > { %v1107_v9 = vpop.xlane.xlu1 %1106 }
 0x48f   : > { %1534 = vpow2.f32 %v981_v8  ;;  %v1111_v10 = vsub.f32 %v1741_v30, %v1107_v9 }
 0x491   : > { %v1113_v11 = vmul.f32 1.442695, %v1111_v10 }
 0x492   : > { %v1125_v15 = vpop.permute.xlu1 %1124 }
 0x493   : > { %1536 = vpow2.f32 %v1113_v11 }
 0x49c   : > { %v1535_v12 = vpop.eup %1534 }
 0x49d   : > { %v985_v13 = vsel %vm717_vm3, %v1535_v12, 0.0  ;;  %v991_v14 = vpack.c.bf16 %v1531_v1, %v1535_v12 }
 0x49e   : > { %986 = vadd.xlane.f32.xlu0 %v985_v13 }
 0x49f   : > { %1471 = vmatmul.mubr.msk.bf16.vlgmr.msra.gmra.mxu0 %vm717_vm3, %v991_v14 }
 0x4a0   : > { %v1537_v16 = vpop.eup %1536  ;;  %1481 = vmatpush3.bf16.msra.mxu0 %v1125_v15  ;;  %1482 = vmatprep.mubr.msk.bf16.mxu0 %vm1563_vm1, %v1562_v20 }
 0x4a1   : > { %v1117_v17 = vsel %vm717_vm3, %v1537_v16, 0.0  ;;  %v1123_v19 = vpack.c.bf16 %v1533_v3, %v1537_v16 }
 0x4a2   : > { %1118 = vadd.xlane.f32.xlu0 %v1117_v17 }
 0x4a6   : > { %731 = vadd.xlane.f32.xlu0 %v730_v18 }
 0x4a7   : > { %1483 = vmatmul.mubr.msk.bf16.vlgmr.msra.gmra.mxu0 %vm717_vm3, %v1123_v19 }
 0x4bb   : > { %v774_v21 = vpop.f32.mrf.mxu0 }
 0x4bd   : > { %v1448_v22 = vpop.f32.mrf.mxu0 }
 0x4bf   : > { %v777_v23 = vpop.f32.mrf.mxu0 }
 0x4c1   : > { %v1449_v24 = vpop.f32.mrf.mxu0 }
 0x4f2   : > { %v854_v25 = vpop.xlane.xlu1 %853 }
 0x4f6   : > { %v857_v31 = vpop.xlane.xlu0 %856 }
 0x4fe   : > { %v990_v26 = vpop.xlane.xlu1 %989 }
 0x506   : > { %v1122_v27 = vpop.xlane.xlu1 %1121 }
 0x50a   : > { %v735_v28 = vpop.xlane.xlu1 %734 }
 0x50b   : > { %1538 = vrcp.f32 %v735_v28 }
 0x50c   : > { %1540 = vrcp.f32 %v854_v25 }
 0x50d   : > { %1542 = vrcp.f32 %v857_v31 }
 0x518   : > { %v1539_v29 = vpop.eup %1538 }
 0x519   : > { %v784_v30 = vmul.f32 %v1539_v29, %v777_v23  ;;  %v1541_v34 = vpop.eup %1540 }
 0x51a   : > { %v1543_v39 = vpop.eup %1542 }
 0x51b   : > { %786 = vst.msk [vmem:[#allocation2 + $0x8] sm:$0xff] %vm669_vm2, %v784_v30 }
 0x527   : > { %v987_v32 = vpop.xlane.xlu0 %986 }
 0x52b   : > { %v1119_v33 = vpop.xlane.xlu0 %1118 }
 0x52e   : > { %v900_v35 = vpop.f32.mrf.mxu0 }
 0x52f   : > { %v909_v36 = vmul.f32 %v1541_v34, %v900_v35  ;;  %v732_v37 = vpop.xlane.xlu0 %731 }
 0x530   : > { %1544 = vrcp.f32 %v732_v37  ;;  %v1460_v38 = vpop.f32.mrf.mxu0 }
 0x531   : > { %913 = vrot.lane.b32.xlu0 %v909_v36, %s1567_s13  ;;  %1546 = vrcp.f32 %v987_v32 }
 0x532   : > { %v903_v40 = vpop.f32.mrf.mxu0  ;;  %1548 = vrcp.f32 %v990_v26 }
 0x533   : > { %v910_v41 = vmul.f32 %v1543_v39, %v903_v40  ;;  %1550 = vrcp.f32 %v1119_v33 }
 0x534   : > { %v1461_v42 = vpop.f32.mrf.mxu0  ;;  %1552 = vrcp.f32 %v1122_v27 }
 0x535   : > { %915 = vrot.lane.b32.xlu1 %v910_v41, %s1567_s13 }
 0x53d   : > { %v1545_v43 = vpop.eup %1544 }
 0x53e   : > { %v783_v44 = vmul.f32 %v1545_v43, %v774_v21  ;;  %v1547_v45 = vpop.eup %1546 }
 0x53f   : > { %v1549_v50 = vpop.eup %1548 }
 0x540   : > { %785 = vst.msk [vmem:[#allocation2] sm:$0xff] %vm669_vm2, %v783_v44  ;;  %v1551_v55 = vpop.eup %1550 }
 0x541   : > { %v1553_v59 = vpop.eup %1552 }
 0x55f   : > { %v1032_v46 = vpop.f32.mrf.mxu0 }
 0x560   : > { %v1041_v47 = vmul.f32 %v1547_v45, %v1032_v46 }
 0x561   : > { %v1472_v48 = vpop.f32.mrf.mxu0 }
 0x562   : > { %1045 = vrot.lane.b32.xlu1 %v1041_v47, %s1568_s16 }
 0x563   : > { %v1035_v51 = vpop.f32.mrf.mxu0 }
 0x564   : > { %v1042_v53 = vmul.f32 %v1549_v50, %v1035_v51 }
 0x565   : > { %v1473_v54 = vpop.f32.mrf.mxu0 }
 0x566   : > { %1047 = vrot.lane.b32.xlu0 %v1042_v53, %s1568_s16 }
 0x567   : > { %v1164_v56 = vpop.f32.mrf.mxu0 }
 0x568   : > { %v1173_v57 = vmul.f32 %v1551_v55, %v1164_v56 }
 0x569   : > { %v1484_v58 = vpop.f32.mrf.mxu0 }
 0x56a   : > { %1177 = vrot.lane.b32.xlu1 %v1173_v57, %s1569_s22 }
 0x56b   : > { %v1167_v60 = vpop.f32.mrf.mxu0 }
 0x56c   : > { %v1174_v61 = vmul.f32 %v1553_v59, %v1167_v60 }
 0x56d   : > { %v1485_v62 = vpop.f32.mrf.mxu0 }
 0x56e   : > { %1179 = vrot.lane.b32.xlu0 %v1174_v61, %s1569_s22 }
 0x5a3   : > { %v914_v63 = vpop.permute.xlu0 %913 }
 0x5a4   : > { %920 = vst.msk [vmem:[#allocation2] sm:$0xff] %vm919_vm4, %v914_v63 }
 0x5a7   : > { %v916_v0 = vpop.permute.xlu1 %915 }
 0x5a8   : > { %921 = vst.msk [vmem:[#allocation2 + $0x8] sm:$0xff] %vm919_vm4, %v916_v0 }
 0x5d4   : > { %v1046_v20 = vpop.permute.xlu1 %1045 }
 0x5d5   : > { %1052 = vst.msk [vmem:[#allocation2] sm:$0xff] %vm1051_vm5, %v1046_v20 }
 0x5d8   : > { %v1048_v1 = vpop.permute.xlu0 %1047 }
 0x5d9   : > { %1053 = vst.msk [vmem:[#allocation2 + $0x8] sm:$0xff] %vm1051_vm5, %v1048_v1 }
 0x5dc   : > { %v1178_v2 = vpop.permute.xlu1 %1177 }
 0x5dd   : > { %1184 = vst.msk [vmem:[#allocation2] sm:$0xff] %vm1183_vm6, %v1178_v2 }
 0x5e0   : > { %v1180_v3 = vpop.permute.xlu0 %1179 }
 0x5e1   : > { %1185 = vst.msk [vmem:[#allocation2 + $0x8] sm:$0xff] %vm1183_vm6, %v1180_v3 }
 0x5e4   : > { %v1186_v4 = vld [vmem:[#allocation2] sm:$0xff] }
 0x5e8   : > { %v1187_v5 = vld [vmem:[#allocation2 + $0x8] sm:$0xff] }
 0x5e9   : > { %v1188_v6 = vpack.c.bf16 %v1187_v5, %v1186_v4 }
 0x5eb   : > { %1491 = vmatmul.mubr.msk.bf16.vlgmr.msra.gmra.mxu1 %vm424_vm0, %v1188_v6 }
 0x6ab   : > { %v1249_v8 = vpop.f32.mrf.mxu1 }
 0x6ac   : > { %v1250_v9 = vadd.f32 %v1378_v7, %v1249_v8 }
 0x6ad   : > { %v1492_v10 = vpop.f32.mrf.mxu1 }
 0x6ae   : > { %1256 = vxpose.xlu1.b32.start [1/2] (short) (narrow) %v1250_v9, 32 }
 0x6af   : > { %v1252_v11 = vpop.f32.mrf.mxu1 }
 0x6b0   : > { %v1253_v12 = vadd.f32 %v1378_v7, %v1252_v11 }
 0x6b1   : > { %v1493_v13 = vpop.f32.mrf.mxu1 }
 0x6b2   : > { %1257 = vxpose.xlu1.b32.end [2/2] (short) (narrow) %v1253_v12, 32 }
 0x72a   : > { %v1272_v14 = vpop.trf.xlu1 }
 0x72b   : > { %1288 = vst.msk [vmem:[%s386_s27] sm:$0xff] %vm717_vm3, %v1272_v14 }
 0x72e   : > { %v1273_v15 = vpop.trf.xlu1 }
 0x72f   : > { %1289 = vst.msk [vmem:[%s386_s27 + $0x8] sm:$0xff] %vm717_vm3, %v1273_v15 }
 0x732   : > { %v1274_v16 = vpop.trf.xlu1 }
 0x733   : > { %1290 = vst.msk [vmem:[%s386_s27 + $0x10] sm:$0xff] %vm717_vm3, %v1274_v16 }
 0x736   : > { %v1275_v17 = vpop.trf.xlu1 }
 0x737   : > { %1291 = vst.msk [vmem:[%s386_s27 + $0x18] sm:$0xff] %vm717_vm3, %v1275_v17 }
 0x738 PF: > { %s21_s17 = sadd.s32 1, %s1560_s17  }
 0x739   : > { %p18_p4 = scmp.ge.s32.totalorder %s21_s17, 4  }
 0x73b   :  { %20 = sbr.rel (!%p18_p4) target bundleno = 1 (0x1), region = 94 }

</bundles_post_ra>
